<compile_context>
chip_gen: v5e
topology: v5e:2x2
jax: 0.10.0
libtpu: 0.0.40
codegen_flags: <defaults>
</compile_context>

<pallas_src>
import functools

import jax
import jax.numpy as jnp
from jax import lax
from jax.experimental import pallas as pl
from jax.experimental.pallas import tpu as pltpu


def _normalize_kernel(scale_smem, bias_smem, x_ref, o_ref, *,
                      num_channels, block_rows):
    # scale_smem/bias_smem: (C,) f32 in SMEM (scalar-prefetched, grid-resident).
    # x_ref/o_ref: (block_rows, block_cols) VMEM tiles of the (N*C, H*W) view.
    row0 = pl.program_id(0) * block_rows
    rows = lax.broadcasted_iota(jnp.int32, (block_rows, 1), 0) + row0
    chan = lax.rem(rows, num_channels)           # row r = n*C + c  ->  c = r % C

    scale = jnp.zeros((block_rows, 1), jnp.float32)
    bias = jnp.zeros((block_rows, 1), jnp.float32)
    for c in range(num_channels):                # C is tiny (3-4): cheap VPU selects
        m = chan == c
        scale = jnp.where(m, scale_smem[c], scale)
        bias = jnp.where(m, bias_smem[c], bias)

    x = x_ref[...].astype(jnp.float32)
    o_ref[...] = (x * scale + bias).astype(o_ref.dtype)


def normalize(x, mean, std, *, block_rows=None, block_cols=None,
              min_pallas_bytes=256 * 1024, donate_input=False):
    """x: (N, C, H, W); mean/std: length-C sequences. Returns (x - mean) / std."""
    N, C, H, W = x.shape
    L = H * W
    NC = N * C
    dtype = x.dtype
    itemsize = jnp.dtype(dtype).itemsize

    # Fold the constants: out = x * (1/std) + (-mean/std), all in f32.
    mean_f = jnp.asarray(mean, jnp.float32).reshape(C)
    std_f = jnp.asarray(std, jnp.float32).reshape(C)
    scale_c = 1.0 / std_f
    bias_c = -mean_f / std_f

    # Tiny tensors: a pallas_call launch costs more than the memory traffic.
    if min_pallas_bytes and x.size * itemsize < min_pallas_bytes:
        out = (x.astype(jnp.float32) * scale_c.reshape(1, C, 1, 1)
               + bias_c.reshape(1, C, 1, 1))
        return out.astype(dtype)

    # Free reshape for contiguous NCHW: lane-dense last dim of size H*W.
    x_rows = x.reshape(NC, L)

    # ~2 MiB per buffer: roofline plateau, safe with double-buffered in+out on
    # v5e (16 MiB scoped) / v6e / v7x (32 MiB scoped).
    target_bytes = 2 << 20
    sublane_pack = 8 * max(1, 4 // itemsize)     # 8 f32, 16 bf16, 32 int8/fp8

    # Lane-dim blocking only when even the minimal row block would be too big.
    if block_cols is None:
        if L % 128 == 0 and sublane_pack * L * itemsize > target_bytes:
            block_cols = max(128,
                             (target_bytes // (sublane_pack * itemsize)) // 128 * 128)
        else:
            block_cols = L
    else:
        block_cols = int(block_cols)
        if block_cols >= L or L % 128 != 0:
            block_cols = L
        else:
            block_cols = max(128, (block_cols // 128) * 128)

    if block_rows is None:
        block_rows = target_bytes // (block_cols * itemsize)
        block_rows = max(sublane_pack, (block_rows // sublane_pack) * sublane_pack)
    else:
        block_rows = int(block_rows)
        block_rows = max(sublane_pack,
                         ((block_rows + sublane_pack - 1) // sublane_pack)
                         * sublane_pack)
    if block_rows >= NC:
        block_rows = NC   # full-extent block dim is always layout-legal

    grid = (pl.cdiv(NC, block_rows), pl.cdiv(L, block_cols))

    kernel = functools.partial(_normalize_kernel,
                               num_channels=C, block_rows=block_rows)

    out_rows = pl.pallas_call(
        kernel,
        out_shape=jax.ShapeDtypeStruct((NC, L), dtype),
        grid_spec=pltpu.PrefetchScalarGridSpec(
            num_scalar_prefetch=2,        # scale_c, bias_c -> SMEM
            grid=grid,
            in_specs=[pl.BlockSpec((block_rows, block_cols),
                                   lambda i, j, s, b: (i, j))],
            out_specs=pl.BlockSpec((block_rows, block_cols),
                                   lambda i, j, s, b: (i, j)),
        ),
        compiler_params=pltpu.CompilerParams(
            dimension_semantics=("parallel", "parallel")),
        # Operand order is (scale, bias, x) -> x is flat input index 2.
        input_output_aliases=({2: 0} if donate_input else {}),
    )(scale_c, bias_c, x_rows)

    return out_rows.reshape(N, C, H, W)


if __name__ == "__main__":
    mean = (0.4914, 0.4822, 0.4465, 0.4823)
    std = (0.2470, 0.2435, 0.2616, 0.2200)

    key = jax.random.PRNGKey(0)
    x = jax.random.normal(key, (2, 4, 16, 16), dtype=jnp.float32)

    # Force the Pallas path (the default fast-path would bypass it at this size).
    out = jax.block_until_ready(normalize(x, mean, std, min_pallas_bytes=0))

    mean_b = jnp.asarray(mean, jnp.float32).reshape(1, 4, 1, 1)
    std_b = jnp.asarray(std, jnp.float32).reshape(1, 4, 1, 1)
    ref = (x - mean_b) / std_b
    assert out.shape == ref.shape and out.dtype == ref.dtype
    assert jnp.allclose(out, ref, atol=1e-5, rtol=1e-5)

    # Exercise the multi-block 2-D tiled path: NC=32, L=1024 -> grid (4, 2).
    x2 = jax.random.normal(jax.random.PRNGKey(1), (8, 4, 32, 32),
                           dtype=jnp.float32)
    out2 = jax.block_until_ready(
        normalize(x2, mean, std, block_rows=8, block_cols=512,
                  min_pallas_bytes=0))
    ref2 = (x2 - mean_b) / std_b
    assert jnp.allclose(out2, ref2, atol=1e-5, rtol=1e-5)

    # Default small-tensor fast path (pure-JAX fusion) stays correct too.
    out3 = jax.block_until_ready(normalize(x, mean, std))
    assert jnp.allclose(out3, ref, atol=1e-5, rtol=1e-5)

    print("KERNEL_OK")
</pallas_src>

<mosaic_0001>
module attributes {stable_mosaic.version = 11 : i64} {
  func.func @_normalize_kernel(%arg0: i32, %arg1: i32, %arg2: memref<4xf32, #tpu.memory_space<smem>>, %arg3: memref<4xf32, #tpu.memory_space<smem>>, %arg4: memref<8x256xf32, #tpu.memory_space<vmem>>, %arg5: memref<8x256xf32, #tpu.memory_space<vmem>>) attributes {dimension_semantics = [#tpu.dimension_semantics<parallel>, #tpu.dimension_semantics<parallel>], iteration_bounds = array<i64: 1, 1>, scalar_prefetch = 2 : i64, scratch_operands = 0 : i64, tpu.core_type = #tpu.core_type<tc>, window_params = [{transform_indices = @transform_0, window_bounds = array<i64: 8, 256>}, {transform_indices = @transform_1, window_bounds = array<i64: 8, 256>}]} {
    %c8_i32 = arith.constant 8 : i32
    %0 = arith.muli %arg0, %c8_i32 : i32
    %1 = tpu.iota {dimensions = array<i32: 0>} : vector<8x1xi32>
    %2 = vector.broadcast %0 : i32 to vector<8x1xi32>
    %3 = arith.addi %1, %2 : vector<8x1xi32>
    %c4_i32 = arith.constant 4 : i32
    %4 = vector.broadcast %c4_i32 : i32 to vector<8x1xi32>
    %5 = arith.remsi %3, %4 : vector<8x1xi32>
    %cst = arith.constant 0.000000e+00 : f32
    %6 = vector.broadcast %cst : f32 to vector<8x1xf32>
    %cst_0 = arith.constant 0.000000e+00 : f32
    %7 = vector.broadcast %cst_0 : f32 to vector<8x1xf32>
    %c0_i32 = arith.constant 0 : i32
    %8 = vector.broadcast %c0_i32 : i32 to vector<8x1xi32>
    %9 = arith.cmpi eq, %5, %8 : vector<8x1xi32>
    %c0 = arith.constant 0 : index
    %10 = memref.load %arg2[%c0] : memref<4xf32, #tpu.memory_space<smem>>
    %11 = vector.broadcast %10 : f32 to vector<8x1xf32>
    %12 = arith.select %9, %11, %6 : vector<8x1xi1>, vector<8x1xf32>
    %c0_1 = arith.constant 0 : index
    %13 = memref.load %arg3[%c0_1] : memref<4xf32, #tpu.memory_space<smem>>
    %14 = vector.broadcast %13 : f32 to vector<8x1xf32>
    %15 = arith.select %9, %14, %7 : vector<8x1xi1>, vector<8x1xf32>
    %c1_i32 = arith.constant 1 : i32
    %16 = vector.broadcast %c1_i32 : i32 to vector<8x1xi32>
    %17 = arith.cmpi eq, %5, %16 : vector<8x1xi32>
    %c1 = arith.constant 1 : index
    %18 = memref.load %arg2[%c1] : memref<4xf32, #tpu.memory_space<smem>>
    %19 = vector.broadcast %18 : f32 to vector<8x1xf32>
    %20 = arith.select %17, %19, %12 : vector<8x1xi1>, vector<8x1xf32>
    %c1_2 = arith.constant 1 : index
    %21 = memref.load %arg3[%c1_2] : memref<4xf32, #tpu.memory_space<smem>>
    %22 = vector.broadcast %21 : f32 to vector<8x1xf32>
    %23 = arith.select %17, %22, %15 : vector<8x1xi1>, vector<8x1xf32>
    %c2_i32 = arith.constant 2 : i32
    %24 = vector.broadcast %c2_i32 : i32 to vector<8x1xi32>
    %25 = arith.cmpi eq, %5, %24 : vector<8x1xi32>
    %c2 = arith.constant 2 : index
    %26 = memref.load %arg2[%c2] : memref<4xf32, #tpu.memory_space<smem>>
    %27 = vector.broadcast %26 : f32 to vector<8x1xf32>
    %28 = arith.select %25, %27, %20 : vector<8x1xi1>, vector<8x1xf32>
    %c2_3 = arith.constant 2 : index
    %29 = memref.load %arg3[%c2_3] : memref<4xf32, #tpu.memory_space<smem>>
    %30 = vector.broadcast %29 : f32 to vector<8x1xf32>
    %31 = arith.select %25, %30, %23 : vector<8x1xi1>, vector<8x1xf32>
    %c3_i32 = arith.constant 3 : i32
    %32 = vector.broadcast %c3_i32 : i32 to vector<8x1xi32>
    %33 = arith.cmpi eq, %5, %32 : vector<8x1xi32>
    %c3 = arith.constant 3 : index
    %34 = memref.load %arg2[%c3] : memref<4xf32, #tpu.memory_space<smem>>
    %35 = vector.broadcast %34 : f32 to vector<8x1xf32>
    %36 = arith.select %33, %35, %28 : vector<8x1xi1>, vector<8x1xf32>
    %c3_4 = arith.constant 3 : index
    %37 = memref.load %arg3[%c3_4] : memref<4xf32, #tpu.memory_space<smem>>
    %38 = vector.broadcast %37 : f32 to vector<8x1xf32>
    %39 = arith.select %33, %38, %31 : vector<8x1xi1>, vector<8x1xf32>
    %c0_5 = arith.constant 0 : index
    %c0_6 = arith.constant 0 : index
    %40 = vector.load %arg4[%c0_5, %c0_6] : memref<8x256xf32, #tpu.memory_space<vmem>>, vector<8x256xf32>
    %41 = vector.broadcast %36 : vector<8x1xf32> to vector<8x256xf32>
    %42 = arith.mulf %40, %41 : vector<8x256xf32>
    %43 = vector.broadcast %39 : vector<8x1xf32> to vector<8x256xf32>
    %44 = arith.addf %42, %43 : vector<8x256xf32>
    %c0_7 = arith.constant 0 : index
    %c0_8 = arith.constant 0 : index
    %45 = vector.load %arg5[%c0_7, %c0_8] : memref<8x256xf32, #tpu.memory_space<vmem>>, vector<8x256xf32>
    tpu.vector_store %arg5[%c0_7, %c0_8], %44 {strides = array<i32>} : memref<8x256xf32, #tpu.memory_space<vmem>>, vector<8x256xf32>,
    return
  }
  func.func @transform_0(%arg0: i32, %arg1: i32, %arg2: memref<4xf32, #tpu.memory_space<smem>>, %arg3: memref<4xf32, #tpu.memory_space<smem>>) -> (i32, i32) {
    %c0_i32 = arith.constant 0 : i32
    return %arg0, %arg1 : i32, i32
  }
  func.func @transform_1(%arg0: i32, %arg1: i32, %arg2: memref<4xf32, #tpu.memory_space<smem>>, %arg3: memref<4xf32, #tpu.memory_space<smem>>) -> (i32, i32) {
    %c0_i32 = arith.constant 0 : i32
    return %arg0, %arg1 : i32, i32
  }
}

</mosaic_0001>

<bundles_post_ra>
// kernel: tpu_custom_call.1
= control target key start
LH: loop header
LB: loop body
LE: loop exit
PB: predicated region body
PF: predicated region fallthrough
CT: control target
= control target key end

     0   :  { %s191_s18 = smov [#allocation3]   ;;  %s192_s19 = smov [#allocation4]   ;;  %s227_s0 = inlined_call_operand.hbm [shape: f32[4], index: 0, kind: input, shape index: {}]   ;;  %s228_s2 = inlined_call_operand.hbm [shape: f32[8,256], index: 2, kind: input, shape index: {}]   ;;  %s229_s3 = inlined_call_operand.hbm [shape: f32[8,256], index: 3, kind: output, shape index: {}]   ;;  %s230_s1 = inlined_call_operand.hbm [shape: f32[4], index: 1, kind: input, shape index: {}]  }
   0x1   :  { %s9_s14 = sshll.u32 %s227_s0, 4  ;;  %s14_s17 = sshll.u32 %s230_s1, 4  ;;  %s10_s14 = int_to_ptr.hbm [resolvable:$true] %s9_s14  ;;  %s15_s17 = int_to_ptr.hbm [resolvable:$true] %s14_s17 }
   0x2   :  { %12 = dma.hbm_to_smem %s10_s14, 16, %s191_s18, [#allocation2] }
   0x3   :  { %17 = dma.hbm_to_smem %s15_s17, 16, %s192_s19, [#allocation2] }
   0x4   :  { %185 = dma.done.wait [#allocation2], 32 }
   0x5   :  { %186 = vsyncadd [#allocation2], 4294967264 }
   0x6   :  { %20 = sfence }
   0x7   :  { %21 = vsyncpa [#allocation6], 0 }
   0x8   :  { %22 = vsyncpa [#allocation7], 0  ;;  %s28_s22 = sshll.u32 %s228_s2, 4  ;;  %s193_s0 = smov [#allocation5]   ;;  %s29_s22 = int_to_ptr.hbm [resolvable:$true] %s28_s22 }
   0x9   :  { %s30_s23 = sshll.u32 %s193_s0, 4  ;;  %s31_s23 = int_to_ptr.vmem [resolvable:$true] %s30_s23 }
   0xa   :  { %33 = dma.hbm_to_vmem [thread:$0]  %s29_s22, 256, %s31_s23, [#allocation6]  }
   0xb   :  { %187 = dma.done.wait [#allocation6], 256  }
   0xc   :  { %188 = vsyncadd [#allocation6], 4294967040  ;;  %v39_v0 = vlaneseq  ;;  %s51_s1 = sld [smem:[#allocation3]]  ;;  %v78_v14 = vld [vmem:[#allocation5] sm:$0xff]  ;;  %v79_v15 = vld [vmem:[#allocation5 + $0x8] sm:$0xff]  ;;  %s194_s30 = smov [#allocation8]  }
   0xd   :  { %s54_s24 = sld [smem:[#allocation4]]  ;;  %s91_s4 = sshll.u32 %s194_s30, 4  ;;  %s92_s4 = int_to_ptr.vmem [resolvable:$true] %s91_s4 }
   0xe   :  { %v40_v1 = vshrl.u32 %v39_v0, 7  ;;  %s103_s25 = sld [smem:[#allocation3 + $0x1]]  ;;  %s93_s7 = sshll.u32 %s229_s3, 4  ;;  %s94_s7 = int_to_ptr.hbm [resolvable:$true] %s93_s7 }
   0xf   :  { %s104_s26 = sld [smem:[#allocation4 + $0x1]] }
  0x10   :  { %v47_v2 = vand.u32 3, %v40_v1  ;;  %s105_s27 = sld [smem:[#allocation3 + $0x2]] }
  0x11   :  { %s106_s28 = sld [smem:[#allocation4 + $0x2]] }
  0x12   :  { %vm50_vm0 = vcmp.eq.s32.totalorder %v47_v2, 0  ;;  %v52_v3 = vstv %s51_s1  ;;  %vm57_vm1 = vcmp.eq.s32.totalorder %v47_v2, 1  ;;  %s107_s2 = sld [smem:[#allocation3 + $0x3]]  ;;  %vm64_vm2 = vcmp.eq.s32.totalorder %v47_v2, 2 }
  0x13   :  { %v53_v4 = vsel %vm50_vm0, %v52_v3, 0.0  ;;  %v55_v5 = vstv %s54_s24  ;;  %s108_s29 = sld [smem:[#allocation4 + $0x3]]  ;;  %vm71_vm3 = vcmp.eq.s32.totalorder %v47_v2, 3 }
  0x14   :  { %v56_v6 = vsel %vm50_vm0, %v55_v5, 0.0  ;;  %v59_v7 = vstv %s103_s25 }
  0x15   :  { %v60_v8 = vsel %vm57_vm1, %v59_v7, %v53_v4  ;;  %v62_v9 = vstv %s104_s26 }
  0x16   :  { %v63_v10 = vsel %vm57_vm1, %v62_v9, %v56_v6  ;;  %v66_v11 = vstv %s105_s27 }
  0x17   :  { %v67_v12 = vsel %vm64_vm2, %v66_v11, %v60_v8  ;;  %v69_v13 = vstv %s106_s28 }
  0x18   :  { %v70_v16 = vsel %vm64_vm2, %v69_v13, %v63_v10  ;;  %v73_v17 = vstv %s107_s2 }
  0x19   :  { %v74_v18 = vsel %vm71_vm3, %v73_v17, %v67_v12  ;;  %v76_v19 = vstv %s108_s29 }
  0x1a   :  { %v77_v20 = vsel %vm71_vm3, %v76_v19, %v70_v16  ;;  %v80_v21 = vmul.f32 %v78_v14, %v74_v18  ;;  %v81_v22 = vmul.f32 %v79_v15, %v74_v18 }
  0x1c   :  { %v82_v23 = vadd.f32 %v80_v21, %v77_v20  ;;  %v83_v24 = vadd.f32 %v81_v22, %v77_v20 }
  0x1e   :  { %84 = vst [vmem:[#allocation8] sm:$0xff] %v82_v23 }
  0x1f   :  { %85 = vst [vmem:[#allocation8 + $0x8] sm:$0xff] %v83_v24 }
  0x20   :  { %96 = dma.vmem_to_hbm [thread:$0]  %s92_s4, 256, %s94_s7, [#allocation7]  }
  0x21   :  { %189 = dma.done.wait [#allocation7], 256  }
  0x22   :  { %190 = vsyncadd [#allocation7], 4294967040 }
  0x23   :  { %101 = vsyncpa [#allocation6], 1 }
  0x24   :  { %102 = vsyncpa [#allocation7], 1 }

</bundles_post_ra>
